<compile_context>
chip_gen: v5e
topology: v5e:2x2
jax: 0.10.0
libtpu: 0.0.40
codegen_flags: <defaults>
</compile_context>

<pallas_src>
import functools

import jax
import jax.numpy as jnp
from jax.experimental import pallas as pl
from jax.experimental.pallas import tpu as pltpu


# ----------------------------------------------------------------------------
# Host-side helpers (constant-folded under jit: they depend only on shapes /
# weights, not on activations)
# ----------------------------------------------------------------------------
def _bilinear_matrix(n_in, n_out):
    """Interpolation matrix for mode='bilinear', align_corners=True."""
    if n_in == 1:
        return jnp.ones((n_out, 1), jnp.float32)
    src = jnp.arange(n_out, dtype=jnp.float32) * (n_in - 1) / (n_out - 1)
    i0 = jnp.clip(jnp.floor(src).astype(jnp.int32), 0, n_in - 2)
    frac = src - i0.astype(jnp.float32)
    rows = jnp.arange(n_out)
    m = jnp.zeros((n_out, n_in), jnp.float32)
    m = m.at[rows, i0].add(1.0 - frac)
    m = m.at[rows, i0 + 1].add(frac)
    return m


def _band_conv_weights(wgt, width):
    """(3,3,Cin,Cout) -> (3, width*Cin, width*Cout) banded matrices.

    B[dh][u*Cin+ci, w*Cout+co] = wgt[dh, u-w+1, ci, co]  (zero outside the band),
    so a 3x3 conv with padding=1 becomes, for each output row h:
        out[h, :] = sum_dh  x_padded_row[h+dh, :] @ B[dh]
    with the W-direction zero padding handled implicitly by the band edges.
    """
    kh, kw, cin, cout = wgt.shape
    u = jnp.arange(width)[None, :, None]
    w = jnp.arange(width)[None, None, :]
    k = (jnp.arange(kw) - 1)[:, None, None]
    onehot = (u - w == k).astype(wgt.dtype)                    # (kw, width, width)
    b = jnp.einsum('kuw,dkio->duiwo', onehot, wgt)             # (kh, W, Cin, W, Cout)
    return b.reshape(kh, width * cin, width * cout)


def fold_bn(conv_bias, gamma, beta, mean, var, eps=1e-5):
    """Fold conv bias + inference BatchNorm into per-channel scale/shift."""
    scale = gamma / jnp.sqrt(var + eps)
    shift = beta + (conv_bias - mean) * scale
    return scale, shift


# ----------------------------------------------------------------------------
# Fused kernel:  upsample + pad + concat + (conv3x3+BN+ReLU) x 2
# Row-flattened NHWC slabs (rows, W*C): every matmul is a plain 2-D MXU op and
# the output store is lane-dense.  The whole batch is processed in one step.
# ----------------------------------------------------------------------------
def _make_fused_kernel(n_img, hs, p, wc_out):
    r = n_img * p                      # total rows incl. per-image 1-row halos
    f32 = jnp.float32
    bf16 = jnp.bfloat16

    def kernel(ahp_ref, x_ref, awc_ref, skip_ref, mask_ref,
               w1_ref, b1_ref, w2_ref, b2_ref, o_ref):
        # ---- bilinear 2x upsample + quirky pad + channel concat ------------
        # AH_pad is block-diagonal over the batch with zero halo rows, so one
        # matmul covers every image (batch folded into M) and the per-image H
        # conv-padding rows come out as exact zeros.
        t = jnp.dot(ahp_ref[...], x_ref[...], preferred_element_type=f32)
        xup = jnp.dot(t.astype(bf16), awc_ref[...], preferred_element_type=f32)
        # skip slab is zero-interleaved / halo-padded on the host -> plain add
        xcat = xup + skip_ref[...].astype(f32)                 # (R, Ws*Cin)

        # ---- conv1 (3x3, pad=1) + folded BN + ReLU --------------------------
        # One MXU matmul with K = 3*Ws*Cin: the three H-shifted row windows are
        # concatenated along lanes (each slice is 128-lane aligned).
        cat1 = jnp.concatenate(
            [xcat[0:r - 2, :], xcat[1:r - 1, :], xcat[2:r, :]],
            axis=1).astype(bf16)
        acc1 = jnp.dot(cat1, w1_ref[...], preferred_element_type=f32)
        # mask zeroes the rows sitting at per-image halo positions so they act
        # as the zero padding for conv2 (garbage there is over-compute, masked).
        h1 = jnp.maximum(acc1 + b1_ref[...], 0.0) * mask_ref[...]
        zrow = jnp.zeros((1, wc_out), f32)
        h1p = jnp.concatenate([zrow, h1, zrow], axis=0)        # (R, Ws*Cout)

        # ---- conv2 (3x3, pad=1) + folded BN + ReLU --------------------------
        cat2 = jnp.concatenate(
            [h1p[0:r - 2, :], h1p[1:r - 1, :], h1p[2:r, :]],
            axis=1).astype(bf16)
        acc2 = jnp.dot(cat2, w2_ref[...], preferred_element_type=f32)
        h2 = jnp.maximum(acc2 + b2_ref[...], 0.0)              # (R-2, Ws*Cout)

        # keep only each image's hs valid rows (drop halo-row positions)
        for i in range(n_img):
            o_ref[i] = h2[i * p:i * p + hs, :].astype(o_ref.dtype)

    return kernel


def upsample_block_forward(x, skip, params):
    """x: (N, Cx, Hx, Wx), skip: (N, Cs, Hs, Ws), both NCHW. Returns NCHW."""
    w1, s1, b1, w2, s2, b2 = params       # w*: (3,3,Cin,Cout); s/b: (Cout,)
    n, cx, hx, wx = x.shape
    ns, cs, hs, ws = skip.shape
    assert ns == n
    cin = cs + cx
    cout = w1.shape[-1]
    assert w1.shape[2] == cin and w2.shape[2] == cout and w2.shape[-1] == cout

    # Reproduce the module's F.pad call exactly: diff_x (an H-diff) pads the W
    # axis, diff_y (a W-diff) pads the H axis.  The pad is folded into the
    # interpolation matrices as zero rows.
    diff_x = hs - 2 * hx
    diff_y = ws - 2 * wx
    assert diff_x >= 0 and diff_y >= 0, "negative pad (crop) not supported"
    assert 2 * hx + diff_y == hs and 2 * wx + diff_x == ws, "incompatible shapes"

    p = hs + 2                 # per-image padded height (1-row conv halo)
    r = n * p
    wc_in = ws * cin
    wc_out = ws * cout

    # --- constant operators (constant-folded under jit) ----------------------
    ah = jnp.pad(_bilinear_matrix(hx, 2 * hx),
                 ((diff_y // 2, diff_y - diff_y // 2), (0, 0)))    # (hs, hx)
    aw = jnp.pad(_bilinear_matrix(wx, 2 * wx),
                 ((diff_x // 2, diff_x - diff_x // 2), (0, 0)))    # (ws, wx)
    # block-diagonal over the batch, with zero halo rows (batch folded into M)
    ah_img = jnp.pad(ah, ((1, 1), (0, 0)))                         # (p, hx)
    ahp = jnp.kron(jnp.eye(n, dtype=jnp.float32), ah_img)          # (r, n*hx)
    # W-upsample combined with "place x channels after the skip channels":
    #   AWC[W*Cx+c, w*Cin + Cs+c] = aw[w, W]
    emb_x = jnp.eye(cin, dtype=jnp.float32)[cs:]                   # (Cx, Cin)
    awc = jnp.einsum('wW,cC->WcwC', aw, emb_x).reshape(wx * cx, wc_in)

    # banded 3x3 conv weights with the BN scale folded in, stacked along K so
    # each conv is a single (rows, 3*W*Cin) @ (3*W*Cin, W*Cout) MXU matmul.
    w1_eff = w1 * s1[None, None, None, :]
    w2_eff = w2 * s2[None, None, None, :]
    w1cat = _band_conv_weights(w1_eff, ws).reshape(3 * wc_in, wc_out)
    w2cat = _band_conv_weights(w2_eff, ws).reshape(3 * wc_out, wc_out)
    b1t = jnp.tile(b1, ws).reshape(1, wc_out)
    b2t = jnp.tile(b2, ws).reshape(1, wc_out)

    # conv1-output row mask: zero at per-image halo-row positions
    row = jnp.arange(1, r - 1)
    mask = ((row % p != 0) & (row % p != p - 1)).astype(jnp.float32)[:, None]

    # --- activations: NCHW -> lane-dense row slabs, bf16 ---------------------
    x_rows = jnp.transpose(x, (0, 2, 3, 1)).reshape(n * hx, wx * cx)
    x_rows = x_rows.astype(jnp.bfloat16)
    # skip zero-interleaved into the concat channel layout + halo-padded rows,
    # so the kernel only has to add it (no ES permutation matmul).
    skip_nhwc = jnp.transpose(skip, (0, 2, 3, 1))                  # (n, hs, ws, cs)
    skip_slab = jnp.pad(skip_nhwc, ((0, 0), (1, 1), (0, 0), (0, cx)))
    skip_slab = skip_slab.reshape(r, wc_in).astype(jnp.bfloat16)

    kernel = _make_fused_kernel(n, hs, p, wc_out)
    out_flat = pl.pallas_call(
        kernel,
        out_shape=jax.ShapeDtypeStruct((n, hs, wc_out), jnp.bfloat16),
        grid_spec=pltpu.PrefetchScalarGridSpec(
            num_scalar_prefetch=0,
            grid=(1,),
            in_specs=[
                pl.BlockSpec((r, n * hx), lambda i: (0, 0)),         # AH_pad
                pl.BlockSpec((n * hx, wx * cx), lambda i: (0, 0)),   # x rows
                pl.BlockSpec((wx * cx, wc_in), lambda i: (0, 0)),    # AWC
                pl.BlockSpec((r, wc_in), lambda i: (0, 0)),          # skip slab
                pl.BlockSpec((r - 2, 1), lambda i: (0, 0)),          # halo mask
                pl.BlockSpec((3 * wc_in, wc_out), lambda i: (0, 0)),  # W1 (K-cat)
                pl.BlockSpec((1, wc_out), lambda i: (0, 0)),          # shift1
                pl.BlockSpec((3 * wc_out, wc_out), lambda i: (0, 0)),  # W2 (K-cat)
                pl.BlockSpec((1, wc_out), lambda i: (0, 0)),          # shift2
            ],
            out_specs=pl.BlockSpec((n, hs, wc_out), lambda i: (0, 0, 0)),
        ),
        compiler_params=pltpu.CompilerParams(
            dimension_semantics=("arbitrary",),
            vmem_limit_bytes=64 * 1024 * 1024,
        ),
    )(ahp.astype(jnp.bfloat16), x_rows, awc.astype(jnp.bfloat16), skip_slab,
      mask, w1cat.astype(jnp.bfloat16), b1t, w2cat.astype(jnp.bfloat16), b2t)

    # (N, Hs, Ws*Cout) bf16 -> NCHW in the caller's dtype.
    # TODO(synk): in a full UNet, keep the flattened NHWC bf16 layout between
    # blocks instead of transposing back to NCHW around every call.
    out = out_flat.reshape(n, hs, ws, cout).astype(x.dtype)
    return jnp.transpose(out, (0, 3, 1, 2))


# ----------------------------------------------------------------------------
# Pure-JAX f32 reference (same folded-BN parameterisation) for self-checking
# ----------------------------------------------------------------------------
def reference_forward(x, skip, params):
    w1, s1, b1, w2, s2, b2 = params
    n, cx, hx, wx = x.shape
    _, cs, hs, ws = skip.shape
    ah = _bilinear_matrix(hx, 2 * hx)
    aw = _bilinear_matrix(wx, 2 * wx)
    xu = jnp.einsum('Hh,nchw->ncHw', ah, x)
    xu = jnp.einsum('Ww,ncHw->ncHW', aw, xu)
    dx = hs - 2 * hx
    dy = ws - 2 * wx
    xu = jnp.pad(xu, ((0, 0), (0, 0),
                      (dy // 2, dy - dy // 2), (dx // 2, dx - dx // 2)))
    xc = jnp.concatenate([skip, xu], axis=1)

    def conv_bn_relu(z, w, scale, shift):
        y = jax.lax.conv_general_dilated(
            z, w, window_strides=(1, 1), padding='SAME',
            dimension_numbers=('NCHW', 'HWIO', 'NCHW'))
        y = y * scale[None, :, None, None] + shift[None, :, None, None]
        return jnp.maximum(y, 0.0)

    h = conv_bn_relu(xc, w1, s1, b1)
    return conv_bn_relu(h, w2, s2, b2)


# ----------------------------------------------------------------------------
# Parameter construction (PyTorch-equivalent layout, BN folded for inference)
# ----------------------------------------------------------------------------
def init_params(key, in_channels, out_channels):
    ks = jax.random.split(key, 8)
    w1 = 0.1 * jax.random.normal(ks[0], (3, 3, in_channels, out_channels), jnp.float32)
    b1 = 0.1 * jax.random.normal(ks[1], (out_channels,), jnp.float32)
    w2 = 0.1 * jax.random.normal(ks[2], (3, 3, out_channels, out_channels), jnp.float32)
    b2 = 0.1 * jax.random.normal(ks[3], (out_channels,), jnp.float32)
    g1 = 1.0 + 0.1 * jax.random.normal(ks[4], (out_channels,), jnp.float32)
    be1 = 0.1 * jax.random.normal(ks[5], (out_channels,), jnp.float32)
    m1 = 0.05 * jnp.arange(out_channels, dtype=jnp.float32)
    v1 = 1.0 + 0.01 * jnp.arange(out_channels, dtype=jnp.float32)
    g2 = 1.0 + 0.1 * jax.random.normal(ks[6], (out_channels,), jnp.float32)
    be2 = 0.1 * jax.random.normal(ks[7], (out_channels,), jnp.float32)
    m2 = -0.03 * jnp.arange(out_channels, dtype=jnp.float32)
    v2 = 1.0 + 0.02 * jnp.arange(out_channels, dtype=jnp.float32)

    s1, sh1 = fold_bn(b1, g1, be1, m1, v1)
    s2, sh2 = fold_bn(b2, g2, be2, m2, v2)
    return (w1, s1, sh1, w2, s2, sh2)


if __name__ == "__main__":
    key = jax.random.PRNGKey(0)
    k_x, k_s, k_p = jax.random.split(key, 3)

    N, Cx, Hx, Wx = 2, 4, 8, 8           # decoder feature map
    Cs, Hs, Ws = 4, 16, 16               # skip connection (2x spatial)
    in_channels = Cx + Cs                # 8
    out_channels = 8

    x = jax.random.normal(k_x, (N, Cx, Hx, Wx), jnp.float32)
    skip = jax.random.normal(k_s, (N, Cs, Hs, Ws), jnp.float32)
    params = init_params(k_p, in_channels, out_channels)

    fwd = jax.jit(functools.partial(upsample_block_forward, params=params))
    out = jax.block_until_ready(fwd(x, skip))

    assert out.shape == (N, out_channels, Hs, Ws), out.shape
    assert bool(jnp.all(jnp.isfinite(out)))

    # loose tolerance: bf16 MXU operands + bf16 output vs f32 reference
    ref = reference_forward(x, skip, params)
    err = float(jnp.max(jnp.abs(out.astype(jnp.float32) - ref)))
    scale = float(jnp.max(jnp.abs(ref)))
    assert err <= 0.05 * scale + 0.05, (err, scale)

    print("KERNEL_OK")
</pallas_src>

<mosaic_0001>
module attributes {stable_mosaic.version = 11 : i64} {
  func.func @kernel(%arg0: i32, %arg1: memref<36x16xbf16, #tpu.memory_space<vmem>>, %arg2: memref<16x32xbf16, #tpu.memory_space<vmem>>, %arg3: memref<32x128xbf16, #tpu.memory_space<vmem>>, %arg4: memref<36x128xbf16, #tpu.memory_space<vmem>>, %arg5: memref<34x1xf32, #tpu.memory_space<vmem>>, %arg6: memref<384x128xbf16, #tpu.memory_space<vmem>>, %arg7: memref<1x128xf32, #tpu.memory_space<vmem>>, %arg8: memref<384x128xbf16, #tpu.memory_space<vmem>>, %arg9: memref<1x128xf32, #tpu.memory_space<vmem>>, %arg10: memref<2x16x128xbf16, #tpu.memory_space<vmem>>) attributes {dimension_semantics = [#tpu.dimension_semantics<arbitrary>], iteration_bounds = array<i64: 1>, scalar_prefetch = 0 : i64, scratch_operands = 0 : i64, tpu.core_type = #tpu.core_type<tc>, window_params = [{pipeline_mode = #tpu.pipeline_mode<synchronous>, transform_indices = @transform_0, window_bounds = array<i64: 36, 16>}, {pipeline_mode = #tpu.pipeline_mode<synchronous>, transform_indices = @transform_1, window_bounds = array<i64: 16, 32>}, {pipeline_mode = #tpu.pipeline_mode<synchronous>, transform_indices = @transform_2, window_bounds = array<i64: 32, 128>}, {pipeline_mode = #tpu.pipeline_mode<synchronous>, transform_indices = @transform_3, window_bounds = array<i64: 36, 128>}, {pipeline_mode = #tpu.pipeline_mode<synchronous>, transform_indices = @transform_4, window_bounds = array<i64: 34, 1>}, {pipeline_mode = #tpu.pipeline_mode<synchronous>, transform_indices = @transform_5, window_bounds = array<i64: 384, 128>}, {pipeline_mode = #tpu.pipeline_mode<synchronous>, transform_indices = @transform_6, window_bounds = array<i64: 1, 128>}, {pipeline_mode = #tpu.pipeline_mode<synchronous>, transform_indices = @transform_7, window_bounds = array<i64: 384, 128>}, {pipeline_mode = #tpu.pipeline_mode<synchronous>, transform_indices = @transform_8, window_bounds = array<i64: 1, 128>}, {pipeline_mode = #tpu.pipeline_mode<synchronous>, transform_indices = @transform_9, window_bounds = array<i64: 2, 16, 128>}]} {
    %c0 = arith.constant 0 : index
    %c0_0 = arith.constant 0 : index
    %0 = vector.load %arg1[%c0, %c0_0] : memref<36x16xbf16, #tpu.memory_space<vmem>>, vector<36x16xbf16>
    %c0_1 = arith.constant 0 : index
    %c0_2 = arith.constant 0 : index
    %1 = vector.load %arg2[%c0_1, %c0_2] : memref<16x32xbf16, #tpu.memory_space<vmem>>, vector<16x32xbf16>
    %cst = arith.constant dense<0.000000e+00> : vector<36x32xf32>
    %2 = tpu.matmul %0, %1, %cst {dimension_numbers = #tpu.dot_dimension_numbers<[1], [0], [0], [1], [0, 0, 1, 1], [], []>} : vector<36x16xbf16>, vector<16x32xbf16>, vector<36x32xf32> -> vector<36x32xf32>
    %3 = arith.truncf %2 : vector<36x32xf32> to vector<36x32xbf16>
    %c0_3 = arith.constant 0 : index
    %c0_4 = arith.constant 0 : index
    %4 = vector.load %arg3[%c0_3, %c0_4] : memref<32x128xbf16, #tpu.memory_space<vmem>>, vector<32x128xbf16>
    %cst_5 = arith.constant dense<0.000000e+00> : vector<36x128xf32>
    %5 = tpu.matmul %3, %4, %cst_5 {dimension_numbers = #tpu.dot_dimension_numbers<[1], [0], [0], [1], [0, 0, 1, 1], [], []>} : vector<36x32xbf16>, vector<32x128xbf16>, vector<36x128xf32> -> vector<36x128xf32>
    %c0_6 = arith.constant 0 : index
    %c0_7 = arith.constant 0 : index
    %6 = vector.load %arg4[%c0_6, %c0_7] : memref<36x128xbf16, #tpu.memory_space<vmem>>, vector<36x128xbf16>
    %7 = arith.extf %6 : vector<36x128xbf16> to vector<36x128xf32>
    %8 = arith.addf %5, %7 : vector<36x128xf32>
    %9 = vector.extract_strided_slice %8 {offsets = [0, 0], sizes = [34, 128], strides = [1, 1]} : vector<36x128xf32> to vector<34x128xf32>
    %10 = vector.extract_strided_slice %8 {offsets = [1, 0], sizes = [34, 128], strides = [1, 1]} : vector<36x128xf32> to vector<34x128xf32>
    %11 = vector.extract_strided_slice %8 {offsets = [2, 0], sizes = [34, 128], strides = [1, 1]} : vector<36x128xf32> to vector<34x128xf32>
    %12 = tpu.concatenate %9, %10, %11 in 1 : vector<34x128xf32>, vector<34x128xf32>, vector<34x128xf32> -> vector<34x384xf32>
    %13 = arith.truncf %12 : vector<34x384xf32> to vector<34x384xbf16>
    %c0_8 = arith.constant 0 : index
    %c0_9 = arith.constant 0 : index
    %14 = vector.load %arg6[%c0_8, %c0_9] : memref<384x128xbf16, #tpu.memory_space<vmem>>, vector<384x128xbf16>
    %cst_10 = arith.constant dense<0.000000e+00> : vector<34x128xf32>
    %15 = tpu.matmul %13, %14, %cst_10 {dimension_numbers = #tpu.dot_dimension_numbers<[1], [0], [0], [1], [0, 0, 1, 1], [], []>} : vector<34x384xbf16>, vector<384x128xbf16>, vector<34x128xf32> -> vector<34x128xf32>
    %c0_11 = arith.constant 0 : index
    %c0_12 = arith.constant 0 : index
    %16 = vector.load %arg7[%c0_11, %c0_12] : memref<1x128xf32, #tpu.memory_space<vmem>>, vector<1x128xf32>
    %17 = vector.broadcast %16 : vector<1x128xf32> to vector<34x128xf32>
    %18 = arith.addf %15, %17 : vector<34x128xf32>
    %cst_13 = arith.constant 0.000000e+00 : f32
    %19 = vector.broadcast %cst_13 : f32 to vector<34x128xf32>
    %20 = arith.maximumf %18, %19 : vector<34x128xf32>
    %c0_14 = arith.constant 0 : index
    %c0_15 = arith.constant 0 : index
    %21 = vector.load %arg5[%c0_14, %c0_15] : memref<34x1xf32, #tpu.memory_space<vmem>>, vector<34x1xf32>
    %22 = vector.broadcast %21 : vector<34x1xf32> to vector<34x128xf32>
    %23 = arith.mulf %20, %22 : vector<34x128xf32>
    %cst_16 = arith.constant 0.000000e+00 : f32
    %24 = vector.broadcast %cst_16 : f32 to vector<1x128xf32>
    %25 = tpu.concatenate %24, %23, %24 in 0 : vector<1x128xf32>, vector<34x128xf32>, vector<1x128xf32> -> vector<36x128xf32>
    %26 = vector.extract_strided_slice %25 {offsets = [0, 0], sizes = [34, 128], strides = [1, 1]} : vector<36x128xf32> to vector<34x128xf32>
    %27 = vector.extract_strided_slice %25 {offsets = [1, 0], sizes = [34, 128], strides = [1, 1]} : vector<36x128xf32> to vector<34x128xf32>
    %28 = vector.extract_strided_slice %25 {offsets = [2, 0], sizes = [34, 128], strides = [1, 1]} : vector<36x128xf32> to vector<34x128xf32>
    %29 = tpu.concatenate %26, %27, %28 in 1 : vector<34x128xf32>, vector<34x128xf32>, vector<34x128xf32> -> vector<34x384xf32>
    %30 = arith.truncf %29 : vector<34x384xf32> to vector<34x384xbf16>
    %c0_17 = arith.constant 0 : index
    %c0_18 = arith.constant 0 : index
    %31 = vector.load %arg8[%c0_17, %c0_18] : memref<384x128xbf16, #tpu.memory_space<vmem>>, vector<384x128xbf16>
    %cst_19 = arith.constant dense<0.000000e+00> : vector<34x128xf32>
    %32 = tpu.matmul %30, %31, %cst_19 {dimension_numbers = #tpu.dot_dimension_numbers<[1], [0], [0], [1], [0, 0, 1, 1], [], []>} : vector<34x384xbf16>, vector<384x128xbf16>, vector<34x128xf32> -> vector<34x128xf32>
    %c0_20 = arith.constant 0 : index
    %c0_21 = arith.constant 0 : index
    %33 = vector.load %arg9[%c0_20, %c0_21] : memref<1x128xf32, #tpu.memory_space<vmem>>, vector<1x128xf32>
    %34 = vector.broadcast %33 : vector<1x128xf32> to vector<34x128xf32>
    %35 = arith.addf %32, %34 : vector<34x128xf32>
    %cst_22 = arith.constant 0.000000e+00 : f32
    %36 = vector.broadcast %cst_22 : f32 to vector<34x128xf32>
    %37 = arith.maximumf %35, %36 : vector<34x128xf32>
    %38 = vector.extract_strided_slice %37 {offsets = [0, 0], sizes = [16, 128], strides = [1, 1]} : vector<34x128xf32> to vector<16x128xf32>
    %39 = arith.truncf %38 : vector<16x128xf32> to vector<16x128xbf16>
    %c0_23 = arith.constant 0 : index
    %c0_24 = arith.constant 0 : index
    %c0_25 = arith.constant 0 : index
    %40 = vector.load %arg10[%c0_23, %c0_24, %c0_25] : memref<2x16x128xbf16, #tpu.memory_space<vmem>>, vector<1x16x128xbf16>
    %41 = vector.shape_cast %40 : vector<1x16x128xbf16> to vector<16x128xbf16>
    %42 = vector.shape_cast %39 : vector<16x128xbf16> to vector<1x16x128xbf16>
    tpu.vector_store %arg10[%c0_23, %c0_24, %c0_25], %42 {strides = array<i32>} : memref<2x16x128xbf16, #tpu.memory_space<vmem>>, vector<1x16x128xbf16>,
    %43 = vector.extract_strided_slice %37 {offsets = [18, 0], sizes = [16, 128], strides = [1, 1]} : vector<34x128xf32> to vector<16x128xf32>
    %44 = arith.truncf %43 : vector<16x128xf32> to vector<16x128xbf16>
    %c1 = arith.constant 1 : index
    %c0_26 = arith.constant 0 : index
    %c0_27 = arith.constant 0 : index
    %45 = vector.load %arg10[%c1, %c0_26, %c0_27] : memref<2x16x128xbf16, #tpu.memory_space<vmem>>, vector<1x16x128xbf16>
    %46 = vector.shape_cast %45 : vector<1x16x128xbf16> to vector<16x128xbf16>
    %47 = vector.shape_cast %44 : vector<16x128xbf16> to vector<1x16x128xbf16>
    tpu.vector_store %arg10[%c1, %c0_26, %c0_27], %47 {strides = array<i32>} : memref<2x16x128xbf16, #tpu.memory_space<vmem>>, vector<1x16x128xbf16>,
    return
  }
  func.func @transform_0(%arg0: i32) -> (i32, i32) {
    %c0_i32 = arith.constant 0 : i32
    %c0_i32_0 = arith.constant 0 : i32
    %c0_i32_1 = arith.constant 0 : i32
    return %c0_i32, %c0_i32_0 : i32, i32
  }
  func.func @transform_1(%arg0: i32) -> (i32, i32) {
    %c0_i32 = arith.constant 0 : i32
    %c0_i32_0 = arith.constant 0 : i32
    %c0_i32_1 = arith.constant 0 : i32
    return %c0_i32, %c0_i32_0 : i32, i32
  }
  func.func @transform_2(%arg0: i32) -> (i32, i32) {
    %c0_i32 = arith.constant 0 : i32
    %c0_i32_0 = arith.constant 0 : i32
    %c0_i32_1 = arith.constant 0 : i32
    return %c0_i32, %c0_i32_0 : i32, i32
  }
  func.func @transform_3(%arg0: i32) -> (i32, i32) {
    %c0_i32 = arith.constant 0 : i32
    %c0_i32_0 = arith.constant 0 : i32
    %c0_i32_1 = arith.constant 0 : i32
    return %c0_i32, %c0_i32_0 : i32, i32
  }
  func.func @transform_4(%arg0: i32) -> (i32, i32) {
    %c0_i32 = arith.constant 0 : i32
    %c0_i32_0 = arith.constant 0 : i32
    %c0_i32_1 = arith.constant 0 : i32
    return %c0_i32, %c0_i32_0 : i32, i32
  }
  func.func @transform_5(%arg0: i32) -> (i32, i32) {
    %c0_i32 = arith.constant 0 : i32
    %c0_i32_0 = arith.constant 0 : i32
    %c0_i32_1 = arith.constant 0 : i32
    return %c0_i32, %c0_i32_0 : i32, i32
  }
  func.func @transform_6(%arg0: i32) -> (i32, i32) {
    %c0_i32 = arith.constant 0 : i32
    %c0_i32_0 = arith.constant 0 : i32
    %c0_i32_1 = arith.constant 0 : i32
    return %c0_i32, %c0_i32_0 : i32, i32
  }
  func.func @transform_7(%arg0: i32) -> (i32, i32) {
    %c0_i32 = arith.constant 0 : i32
    %c0_i32_0 = arith.constant 0 : i32
    %c0_i32_1 = arith.constant 0 : i32
    return %c0_i32, %c0_i32_0 : i32, i32
  }
  func.func @transform_8(%arg0: i32) -> (i32, i32) {
    %c0_i32 = arith.constant 0 : i32
    %c0_i32_0 = arith.constant 0 : i32
    %c0_i32_1 = arith.constant 0 : i32
    return %c0_i32, %c0_i32_0 : i32, i32
  }
  func.func @transform_9(%arg0: i32) -> (i32, i32, i32) {
    %c0_i32 = arith.constant 0 : i32
    %c0_i32_0 = arith.constant 0 : i32
    %c0_i32_1 = arith.constant 0 : i32
    %c0_i32_2 = arith.constant 0 : i32
    return %c0_i32, %c0_i32_0, %c0_i32_1 : i32, i32, i32
  }
}

</mosaic_0001>

<bundles_post_ra>
// kernel: tile.10
= control target key start
LH: loop header
LB: loop body
LE: loop exit
PB: predicated region body
PF: predicated region fallthrough
CT: control target
= control target key end

     0   :  { %s28_s0 = inlined_call_operand.vmem [shape: f32[8], index: 0, kind: input, shape index: {}]   ;;  %s29_s1 = inlined_call_operand.vmem [shape: f32[16,8], index: 1, kind: output, shape index: {}]  }
   0x1   :  { %v4_v0 = vld [vmem:[%s28_s0] ss:$0 sm:$0xff] }
   0x2   :  { %5 = vst [vmem:[%s29_s1] sm:$0xff] %v4_v0 }
   0x3   :  { %8 = vst [vmem:[%s29_s1 + $0x8] sm:$0xff] %v4_v0 }

// kernel: tile.11
= control target key start
LH: loop header
LB: loop body
LE: loop exit
PB: predicated region body
PF: predicated region fallthrough
CT: control target
= control target key end

     0   :  { %s131_s10 = smov 120   ;;  %s132_s11 = smov 104   ;;  %vm3_vm0 = vcmask 64512   ;;  %vm9_vm1 = vcmask 1048512   ;;  %vm15_vm2 = vcmask 982912   ;;  %vm21_vm3 = vcmask 917312   ;;  %s207_s0 = inlined_call_operand.vmem [shape: f32[16,8], index: 0, kind: input, shape index: {}]   ;;  %s208_s1 = inlined_call_operand.vmem [shape: f32[1,128], index: 1, kind: output, shape index: {}]  }
   0x1   :  { %v101_v0 = vld [vmem:[%s207_s0 + $0xf] sm:$0x1]   ;;  %v103_v1 = vld [vmem:[%s207_s0 + $0xd] sm:$0x1]   ;;  %v105_v2 = vld [vmem:[%s207_s0 + $0xb] sm:$0x1]  }
   0x2   :  { %7 = vrot.lane.b32.xlu0 %v101_v0, %s131_s10  ;;  %19 = vrot.lane.b32.xlu1 %v103_v1, %s132_s11  ;;  %s133_s14 = smov 88   ;;  %v102_v3 = vld [vmem:[%s207_s0 + $0xe] sm:$0x1]   ;;  %v104_v4 = vld [vmem:[%s207_s0 + $0xc] sm:$0x1]   ;;  %s134_s19 = smov 112  }
   0x3   :  { %31 = vrot.lane.b32.xlu2 %v105_v2, %s133_s14  ;;  %s135_s20 = smov 96   ;;  %v106_v5 = vld [vmem:[%s207_s0 + $0xa] sm:$0x1]   ;;  %s136_s23 = smov 80   ;;  %v107_v6 = vld [vmem:[%s207_s0 + $0x9] sm:$0x1]  }
   0x4   :  { %v108_v7 = vld [vmem:[%s207_s0 + $0x8] sm:$0x1]   ;;  %s137_s28 = smov 72   ;;  %s138_s29 = smov 64   ;;  %v109_v8 = vld [vmem:[%s207_s0 + $0x7] sm:$0x1]  }
   0x5   :  { %s139_s3 = smov 56   ;;  %v110_v9 = vld [vmem:[%s207_s0 + $0x6] sm:$0x1]   ;;  %v111_v10 = vld [vmem:[%s207_s0 + $0x5] sm:$0x1]   ;;  %s140_s8 = smov 48  }
   0x6   :  { %s141_s9 = smov 40   ;;  %v112_v11 = vld [vmem:[%s207_s0 + $0x4] sm:$0x1]   ;;  %s142_s12 = smov 32   ;;  %v113_v12 = vld [vmem:[%s207_s0 + $0x3] sm:$0x1]  }
   0x7   :  { %v114_v13 = vld [vmem:[%s207_s0 + $0x2] sm:$0x1]   ;;  %s143_s17 = smov 24   ;;  %s144_s18 = smov 16   ;;  %v115_v14 = vld [vmem:[%s207_s0 + $0x1] sm:$0x1]  }
   0x8   :  { %s145_s21 = smov 8   ;;  %v2_v15 = vld [vmem:[%s207_s0] sm:$0x1]   ;;  %vm27_vm4 = vcmask 851712   ;;  %vm33_vm5 = vcmask 786112   ;;  %vm39_vm6 = vcmask 720512  }
   0x9   :  { %4 = vst.msk [vmem:[#allocation0] sm:$0x1] %vm3_vm0, %v2_v15   ;;  %vm45_vm7 = vcmask 654912   ;;  %vm51_vm8 = vcmask 589312   ;;  %vm57_vm9 = vcmask 523712   ;;  %vm63_vm10 = vcmask 458112  }
   0xa   :  { %13 = vrot.lane.b32.xlu0 %v102_v3, %s134_s19  ;;  %25 = vrot.lane.b32.xlu1 %v104_v4, %s135_s20  ;;  %vm69_vm11 = vcmask 392512   ;;  %vm75_vm12 = vcmask 326912   ;;  %vm81_vm13 = vcmask 261312   ;;  %vm87_vm14 = vcmask 195712  }
   0xb   :  { %37 = vrot.lane.b32.xlu2 %v106_v5, %s136_s23  ;;  %vm93_vm15 = vcmask 130112  }
  0x12   :  { %43 = vrot.lane.b32.xlu0 %v107_v6, %s137_s28  ;;  %49 = vrot.lane.b32.xlu1 %v108_v7, %s138_s29 }
  0x13   :  { %55 = vrot.lane.b32.xlu2 %v109_v8, %s139_s3 }
  0x1a   :  { %61 = vrot.lane.b32.xlu0 %v110_v9, %s140_s8  ;;  %67 = vrot.lane.b32.xlu1 %v111_v10, %s141_s9 }
  0x1b   :  { %73 = vrot.lane.b32.xlu2 %v112_v11, %s142_s12 }
  0x22   :  { %79 = vrot.lane.b32.xlu0 %v113_v12, %s143_s17  ;;  %85 = vrot.lane.b32.xlu1 %v114_v13, %s144_s18 }
  0x23   :  { %91 = vrot.lane.b32.xlu2 %v115_v14, %s145_s21 }
  0x5d   :  { %v32_v16 = vpop.permute.xlu2 %31  }
  0x65   :  { %v38_v17 = vpop.permute.xlu2 %37  }
  0x6d   :  { %v56_v18 = vpop.permute.xlu2 %55  }
  0x74   :  { %v8_v19 = vpop.permute.xlu0 %7   ;;  %v20_v20 = vpop.permute.xlu1 %19  }
  0x75   :  { %10 = vst.msk [vmem:[#allocation0] sm:$0x1] %vm9_vm1, %v8_v19   ;;  %v74_v21 = vpop.permute.xlu2 %73  }
  0x7c   :  { %v14_v22 = vpop.permute.xlu0 %13   ;;  %v26_v23 = vpop.permute.xlu1 %25  }
  0x7d   :  { %16 = vst.msk [vmem:[#allocation0] sm:$0x1] %vm15_vm2, %v14_v22   ;;  %v92_v24 = vpop.permute.xlu2 %91  }
  0x7e   :  { %22 = vst.msk [vmem:[#allocation0] sm:$0x1] %vm21_vm3, %v20_v20  }
  0x7f   :  { %28 = vst.msk [vmem:[#allocation0] sm:$0x1] %vm27_vm4, %v26_v23  }
  0x80   :  { %34 = vst.msk [vmem:[#allocation0] sm:$0x1] %vm33_vm5, %v32_v16  }
  0x81   :  { %40 = vst.msk [vmem:[#allocation0] sm:$0x1] %vm39_vm6, %v38_v17  }
  0x84   :  { %v44_v25 = vpop.permute.xlu0 %43   ;;  %v50_v26 = vpop.permute.xlu1 %49  }
  0x85   :  { %46 = vst.msk [vmem:[#allocation0] sm:$0x1] %vm45_vm7, %v44_v25  }
  0x86   :  { %52 = vst.msk [vmem:[#allocation0] sm:$0x1] %vm51_vm8, %v50_v26  }
  0x87   :  { %58 = vst.msk [vmem:[#allocation0] sm:$0x1] %vm57_vm9, %v56_v18  }
  0x8c   :  { %v62_v27 = vpop.permute.xlu0 %61   ;;  %v68_v28 = vpop.permute.xlu1 %67  }
  0x8d   :  { %64 = vst.msk [vmem:[#allocation0] sm:$0x1] %vm63_vm10, %v62_v27  }
  0x8e   :  { %70 = vst.msk [vmem:[#allocation0] sm:$0x1] %vm69_vm11, %v68_v28  }
  0x8f   :  { %76 = vst.msk [vmem:[#allocation0] sm:$0x1] %vm75_vm12, %v74_v21  }
  0x94   :  { %v80_v29 = vpop.permute.xlu0 %79   ;;  %v86_v30 = vpop.permute.xlu1 %85  }
  0x95   :  { %82 = vst.msk [vmem:[#allocation0] sm:$0x1] %vm81_vm13, %v80_v29  }
  0x96   :  { %88 = vst.msk [vmem:[#allocation0] sm:$0x1] %vm87_vm14, %v86_v30  }
  0x97   :  { %94 = vst.msk [vmem:[#allocation0] sm:$0x1] %vm93_vm15, %v92_v24  }
  0x9e   :  { %v97_v31 = vld [vmem:[#allocation0] sm:$0x1] }
  0x9f   :  { %100 = vst [vmem:[%s208_s1] sm:$0x1] %v97_v31 }

// kernel: upsample_block_forward.1
= control target key start
LH: loop header
LB: loop body
LE: loop exit
PB: predicated region body
PF: predicated region fallthrough
CT: control target
= control target key end

     0   :  { %vm59_vm0 = vcmask 130048   ;;  %vm121_vm1 = vcmask 261120   ;;  %v1166_v53 = vmov 0   ;;  %vm159_vm2 = vcmask 1046528   ;;  %s1455_s1 = inlined_call_operand.vmem [shape: bf16[16,32], index: 1, kind: input, shape index: {}]   ;;  %s1456_s0 = inlined_call_operand.vmem [shape: bf16[36,16], index: 0, kind: input, shape index: {}]   ;;  %s1457_s2 = inlined_call_operand.vmem [shape: bf16[32,128], index: 2, kind: input, shape index: {}]   ;;  %s1458_s5 = inlined_call_operand.vmem [shape: bf16[384,128], index: 5, kind: input, shape index: {}]   ;;  %s1459_s6 = inlined_call_operand.vmem [shape: f32[1,128], index: 6, kind: input, shape index: {}]   ;;  %s1460_s3 = inlined_call_operand.vmem [shape: bf16[36,128], index: 3, kind: input, shape index: {}]   ;;  %s1461_s4 = inlined_call_operand.vmem [shape: f32[34,1], index: 4, kind: input, shape index: {}]   ;;  %s1462_s7 = inlined_call_operand.vmem [shape: bf16[384,128], index: 7, kind: input, shape index: {}]   ;;  %s1463_s8 = inlined_call_operand.vmem [shape: f32[1,128], index: 8, kind: input, shape index: {}]   ;;  %s1464_s9 = inlined_call_operand.vmem [shape: bf16[2,16,128], index: 9, kind: output, shape index: {}]  }
   0x1   :  { %v1094_v0 = vld [vmem:[%s1455_s1] sm:$0xff]  ;;  %v1093_v2 = vld [vmem:[%s1456_s0 + $0x8] sm:$0xff]  ;;  %v37_v3 = vld [vmem:[%s1456_s0 + $0x10] sm:$0x3]  ;;  %1161 = vset.pattern.permute.xlu0 %v1166_v53  ;;  %1162 = vset.pattern.permute.xlu1 %v1166_v53  ;;  %vm174_vm3 = vcmask 1045504   ;;  %vm508_vm4 = vcmask 1040384  }
   0x2   :  { %v1092_v1 = vld [vmem:[%s1456_s0] sm:$0xff]  ;;  %76 = vmatpush.bf16.msra.mxu0 %v1094_v0  ;;  %v49_v4 = vunpack.c.l.b16 %v37_v3  ;;  %v1096_v6 = vld [vmem:[%s1457_s2 + $0x8] sm:$0xff]  ;;  %v1104_v11 = vld [vmem:[%s1458_s5 + $0x38] sm:$0xff]  ;;  %1163 = vset.pattern.permute.xlu2 %v1166_v53  ;;  %vm1167_vm6 = vmmov 1   ;;  %vm524_vm8 = vcmask 1042432   ;;  %vm846_vm10 = vcmask 1046532  }
   0x3   :  { %137 = vmatpush.bf16.msra.mxu1 %v1096_v6  ;;  %v1095_v7 = vld [vmem:[%s1457_s2] sm:$0xff]  ;;  %v1120_v12 = vld [vmem:[%s1458_s5 + $0xb8] sm:$0xff]  ;;  %394 = vmatpush.bf16.msra.mxu2 %v1104_v11  ;;  %v1103_v14 = vld [vmem:[%s1458_s5 + $0x30] sm:$0xff] }
   0x4   :  { %v52_v5 = vpack.c.b16 %v49_v4, %v49_v4  ;;  %v1112_v13 = vld [vmem:[%s1458_s5 + $0x78] sm:$0xff]  ;;  %v1119_v15 = vld [vmem:[%s1458_s5 + $0xb0] sm:$0xff]  ;;  %v1102_v18 = vld [vmem:[%s1458_s5 + $0x28] sm:$0xff] }
   0x5   :  { %876 = vmatmul.msk.bf16.vlgmr.msra.gmra.mxu0 %vm59_vm0, %v1092_v1  ;;  %417 = vmatpush.bf16.msra.mxu3 %v1112_v13  ;;  %v1111_v16 = vld [vmem:[%s1458_s5 + $0x70] sm:$0xff]  ;;  %v1118_v19 = vld [vmem:[%s1458_s5 + $0xa8] sm:$0xff]  ;;  %v1101_v20 = vld [vmem:[%s1458_s5 + $0x20] sm:$0xff] }
   0x6   :  { %440 = vmatpush.bf16.msrb.mxu0 %v1120_v12  ;;  %v1100_v23 = vld [vmem:[%s1458_s5 + $0x18] sm:$0xff]  ;;  %v1110_v27 = vld [vmem:[%s1458_s5 + $0x68] sm:$0xff]  ;;  %v1099_v28 = vld [vmem:[%s1458_s5 + $0x10] sm:$0xff] }
   0x7   :  { %138 = vmatpush.bf16.msra.mxu1 %v1095_v7  ;;  %395 = vmatpush.bf16.msra.mxu2 %v1103_v14  ;;  %v1117_v29 = vld [vmem:[%s1458_s5 + $0xa0] sm:$0xff]  ;;  %v1098_v31 = vld [vmem:[%s1458_s5 + $0x8] sm:$0xff]  ;;  %v1116_v32 = vld [vmem:[%s1458_s5 + $0x98] sm:$0xff] }
   0x8   :  { %v1109_v30 = vld [vmem:[%s1458_s5 + $0x60] sm:$0xff]  ;;  %v1108_v33 = vld [vmem:[%s1458_s5 + $0x58] sm:$0xff]  ;;  %v1107_v35 = vld [vmem:[%s1458_s5 + $0x50] sm:$0xff] }
   0x9   :  { %418 = vmatpush.bf16.msra.mxu3 %v1111_v16  ;;  %v1097_v34 = vld [vmem:[%s1458_s5] sm:$0xff]  ;;  %v1115_v36 = vld [vmem:[%s1458_s5 + $0x90] sm:$0xff]  ;;  %v1106_v37 = vld [vmem:[%s1458_s5 + $0x48] sm:$0xff] }
   0xa   :  { %441 = vmatpush.bf16.msrb.mxu0 %v1119_v15  ;;  %v1114_v38 = vld [vmem:[%s1458_s5 + $0x88] sm:$0xff]  ;;  %v1105_v39 = vld [vmem:[%s1458_s5 + $0x40] sm:$0xff]  ;;  %v470_v52 = vld [vmem:[%s1461_s4 + $0x10] sm:$0xff] }
   0xb   :  { %396 = vmatpush.bf16.msra.mxu2 %v1102_v18  ;;  %v1113_v40 = vld [vmem:[%s1458_s5 + $0x80] sm:$0xff]  ;;  %v1158_v48 = vld [vmem:[%s1460_s3 + $0x8] sm:$0xff]   ;;  %485 = vperm.xlu1 %1162, %v470_v52   ;;  %v471_v7 = vld [vmem:[%s1461_s4 + $0x18] sm:$0xff] }
   0xc   :  { %v1146_v42 = vld [vmem:[%s1460_s3] sm:$0xff]   ;;  %v1151_v50 = vunpack.c.l.bf16 %v1158_v48  ;;  %v1152_v62 = vunpack.c.h.bf16 %v1158_v48  ;;  %v469_v63 = vld [vmem:[%s1461_s4 + $0x8] sm:$0xff]  ;;  %v1144_v11 = vld [vmem:[%s1462_s7 + $0xb8] sm:$0xff] }
   0xd   :  { %419 = vmatpush.bf16.msra.mxu3 %v1110_v27  ;;  %v1147_v43 = vunpack.c.l.bf16 %v1146_v42  ;;  %v1148_v44 = vunpack.c.h.bf16 %v1146_v42  ;;  %v468_v51 = vld [vmem:[%s1461_s4] sm:$0xff]  ;;  %v103_v12 = vld [vmem:[%s1460_s3 + $0x10] sm:$0x3]  ;;  %vm1082_vm5 = vmneg %vm508_vm4 }
   0xe   :  { %442 = vmatpush.bf16.msrb.mxu0 %v1118_v19  ;;  %475 = vperm.xlu0 %1161, %v468_v51   ;;  %v108_v14 = vunpack.c.l.bf16 %v103_v12  ;;  %v1123_v42 = vld [vmem:[%s1462_s7 + $0x10] sm:$0xff]  ;;  %v1138_v51 = vld [vmem:[%s1462_s7 + $0x88] sm:$0xff]  ;;  %v1412_v53 = vld [vmem:[%s1459_s6] ss:$0 sm:$0xff] }
   0xf   :  { %397 = vmatpush.bf16.msra.mxu2 %v1101_v20  ;;  %v1139_v48 = vld [vmem:[%s1462_s7 + $0x90] sm:$0xff]  ;;  %vm1083_vm7 = vmpackc.low %vm1167_vm6, %vm1082_vm5 }
  0x10   :  { %vm1086_vm9 = vmpackc.low %vm524_vm8, %vm524_vm8 }
  0x11   :  { %420 = vmatpush.bf16.msra.mxu3 %v1109_v30  ;;  %vm847_vm11 = vmor %vm524_vm8, %vm846_vm10 }
  0x12   :  { %443 = vmatpush.bf16.msrb.mxu0 %v1117_v29 }
  0x13   :  { %398 = vmatpush.bf16.msra.mxu2 %v1100_v23  ;;  %490 = vperm.xlu1 %1162, %v471_v7  }
  0x15   :  { %877 = vmatmul.msk.bf16.gmra.mxu0 %vm59_vm0, %v1093_v2  ;;  %421 = vmatpush.bf16.msra.mxu3 %v1108_v33  ;;  %v1127_v33 = vld [vmem:[%s1462_s7 + $0x30] sm:$0xff] }
  0x16   :  { %444 = vmatpush.bf16.msrb.mxu0 %v1116_v32  ;;  %480 = vperm.xlu0 %1161, %v469_v63   ;;  %v1135_v32 = vld [vmem:[%s1462_s7 + $0x70] sm:$0xff] }
  0x17   :  { %399 = vmatpush.bf16.msra.mxu2 %v1099_v28 }
  0x19   :  { %422 = vmatpush.bf16.msra.mxu3 %v1107_v35  ;;  %v1126_v35 = vld [vmem:[%s1462_s7 + $0x28] sm:$0xff] }
  0x1a   :  { %445 = vmatpush.bf16.msrb.mxu0 %v1115_v36  ;;  %v1134_v36 = vld [vmem:[%s1462_s7 + $0x68] sm:$0xff] }
  0x1b   :  { %400 = vmatpush.bf16.msra.mxu2 %v1098_v31  ;;  %v1128_v31 = vld [vmem:[%s1462_s7 + $0x38] sm:$0xff] }
  0x1c   :  { %761 = vmatpush.bf16.msrb.mxu1 %v1128_v31 }
  0x1d   :  { %423 = vmatpush.bf16.msra.mxu3 %v1106_v37  ;;  %v1125_v37 = vld [vmem:[%s1462_s7 + $0x20] sm:$0xff] }
  0x1e   :  { %446 = vmatpush.bf16.msrb.mxu0 %v1114_v38  ;;  %v1142_v38 = vld [vmem:[%s1462_s7 + $0xa8] sm:$0xff] }
  0x1f   :  { %401 = vmatpush.bf16.msra.mxu2 %v1097_v34  ;;  %v1143_v34 = vld [vmem:[%s1462_s7 + $0xb0] sm:$0xff] }
  0x20   :  { %762 = vmatpush.bf16.msrb.mxu1 %v1127_v33 }
  0x21   :  { %424 = vmatpush.bf16.msra.mxu3 %v1105_v39  ;;  %v1133_v39 = vld [vmem:[%s1462_s7 + $0x60] sm:$0xff] }
  0x22   :  { %447 = vmatpush.bf16.msrb.mxu0 %v1113_v40  ;;  %v1124_v40 = vld [vmem:[%s1462_s7 + $0x18] sm:$0xff] }
  0x24   :  { %763 = vmatpush.bf16.msrb.mxu1 %v1126_v35 }
  0x25   :  { %878 = vmatmul.msk.bf16.gmra.mxu0 %vm59_vm0, %v52_v5  ;;  %807 = vmatpush.bf16.msrb.mxu3 %v1144_v11 }
  0x28   :  { %764 = vmatpush.bf16.msrb.mxu1 %v1125_v37 }
  0x29   :  { %808 = vmatpush.bf16.msrb.mxu3 %v1143_v34 }
  0x2c   :  { %765 = vmatpush.bf16.msrb.mxu1 %v1124_v40 }
  0x2d   :  { %809 = vmatpush.bf16.msrb.mxu3 %v1142_v38 }
  0x30   :  { %766 = vmatpush.bf16.msrb.mxu1 %v1123_v42 }
  0x82   :  { %v78_v8 = vpop.f32.mrf.mxu0 }
  0x8a   :  { %v80_v9 = vpop.f32.mrf.mxu0 }
  0x8b   :  { %v92_v10 = vpack.c.bf16 %v80_v9, %v78_v8  ;;  %v472_v8 = vld [vmem:[%s1461_s4 + $0x20] sm:$0x3]  ;;  %v1136_v9 = vld [vmem:[%s1462_s7 + $0x78] sm:$0xff] }
  0x8c   :  { %495 = vperm.xlu2 %1163, %v472_v8   ;;  %784 = vmatpush.bf16.msrb.mxu2 %v1136_v9 }
  0x8d   :  { %887 = vmatmul.msk.bf16.vlgmr.msra.gmra.mxu1 %vm121_vm1, %v92_v10 }
  0x90   :  { %785 = vmatpush.bf16.msrb.mxu2 %v1135_v32 }
  0x92   :  { %v83_v17 = vpop.f32.mrf.mxu0 }
  0x94   :  { %786 = vmatpush.bf16.msrb.mxu2 %v1134_v36 }
  0x98   :  { %787 = vmatpush.bf16.msrb.mxu2 %v1133_v39 }
  0x9a   :  { %v85_v21 = vpop.f32.mrf.mxu0 }
  0x9b   :  { %v93_v22 = vpack.c.bf16 %v85_v21, %v83_v17 }
  0x9d   :  { %888 = vmatmul.msk.bf16.gmra.mxu1 %vm121_vm1, %v93_v22 }
  0xa2   :  { %v88_v24 = vpop.f32.mrf.mxu0 }
  0xa3   :  { %v94_v25 = vpack.c.bf16 %v88_v24, %v88_v24 }
  0xaa   :  { %v90_v26 = vpop.f32.mrf.mxu0 }
  0xad   :  { %889 = vmatmul.msk.bf16.gmra.mxu1 %vm121_vm1, %v94_v25 }
 0x10a   :  { %v140_v41 = vpop.f32.mrf.mxu1 }
 0x10b   :  { %v141_v46 = vadd.f32 %v1147_v43, %v140_v41  ;;  %v1141_v41 = vld [vmem:[%s1462_s7 + $0xa0] sm:$0xff]  ;;  %v1132_v43 = vld [vmem:[%s1462_s7 + $0x58] sm:$0xff] }
 0x10c   :  { %810 = vmatpush.bf16.msrb.mxu3 %v1141_v41  ;;  %788 = vmatpush.bf16.msrb.mxu2 %v1132_v43 }
 0x10d   :  { %v160_v58 = vrot.slane %v141_v46, 1  ;;  %v175_v59 = vrot.slane %v141_v46, 2 }
 0x112   :  { %v142_v45 = vpop.f32.mrf.mxu1 }
 0x113   :  { %v143_v47 = vadd.f32 %v1148_v44, %v142_v45  ;;  %v1140_v44 = vld [vmem:[%s1462_s7 + $0x98] sm:$0xff]  ;;  %v1122_v45 = vld [vmem:[%s1462_s7 + $0x8] sm:$0xff] }
 0x114   :  { %811 = vmatpush.bf16.msrb.mxu3 %v1140_v44  ;;  %767 = vmatpush.bf16.msrb.mxu1 %v1122_v45 }
 0x115   :  { %v189_v49 = vpack.c.bf16 %v143_v47, %v141_v46  ;;  %v161_v55 = vrot.slane %v143_v47, 1  ;;  %v176_v56 = vrot.slane %v143_v47, 2  ;;  %v1121_v46 = vld [vmem:[%s1462_s7] sm:$0xff]  ;;  %v1131_v47 = vld [vmem:[%s1462_s7 + $0x50] sm:$0xff] }
 0x116   :  { %789 = vmatpush.bf16.msrb.mxu2 %v1131_v47 }
 0x117   :  { %402 = vmatmul.bf16.vlgmr.msra.gmra.mxu2 %v189_v49  ;;  %v162_v0 = vsel %vm159_vm2, %v160_v58, %v161_v55  ;;  %v177_v2 = vsel %vm174_vm3, %v175_v59, %v176_v56 }
 0x118   :  { %768 = vmatpush.bf16.msrb.mxu1 %v1121_v46  ;;  %812 = vmatpush.bf16.msrb.mxu3 %v1139_v48 }
 0x11a   :  { %v145_v54 = vpop.f32.mrf.mxu1 }
 0x11b   :  { %v146_v57 = vadd.f32 %v1151_v50, %v145_v54  ;;  %v1130_v50 = vld [vmem:[%s1462_s7 + $0x48] sm:$0xff]  ;;  %v1129_v54 = vld [vmem:[%s1462_s7 + $0x40] sm:$0xff] }
 0x11c   :  { %790 = vmatpush.bf16.msrb.mxu2 %v1130_v50  ;;  %813 = vmatpush.bf16.msrb.mxu3 %v1138_v51 }
 0x11d   :  { %v163_v60 = vrot.slane %v146_v57, 1  ;;  %v178_v61 = vrot.slane %v146_v57, 2 }
 0x11f   :  { %v164_v1 = vsel %vm159_vm2, %v161_v55, %v163_v60  ;;  %v179_v3 = vsel %vm174_vm3, %v176_v56, %v178_v61  ;;  %v1137_v55 = vld [vmem:[%s1462_s7 + $0x80] sm:$0xff] }
 0x120   :  { %v190_v4 = vpack.c.bf16 %v164_v1, %v162_v0  ;;  %v191_v5 = vpack.c.bf16 %v179_v3, %v177_v2  ;;  %791 = vmatpush.bf16.msrb.mxu2 %v1129_v54  ;;  %814 = vmatpush.bf16.msrb.mxu3 %v1137_v55 }
 0x122   :  { %v147_v6 = vpop.f32.mrf.mxu1  ;;  %425 = vmatmul.bf16.vlgmr.msra.gmra.mxu3 %v190_v4  ;;  %448 = vmatmul.bf16.vlgmr.msrb.gmra.mxu0 %v191_v5 }
 0x123   :  { %v148_v10 = vadd.f32 %v1152_v62, %v147_v6 }
 0x125   :  { %v192_v13 = vpack.c.bf16 %v148_v10, %v146_v57  ;;  %v165_v16 = vrot.slane %v148_v10, 1  ;;  %v180_v17 = vrot.slane %v148_v10, 2 }
 0x127   :  { %407 = vmatmul.bf16.gmra.mxu2 %v192_v13  ;;  %v166_v21 = vsel %vm159_vm2, %v163_v60, %v165_v16  ;;  %v181_v23 = vsel %vm174_vm3, %v178_v61, %v180_v17  ;;  %v476_v61 = vpop.permute.xlu0 %475 }
 0x12a   :  { %v150_v15 = vpop.f32.mrf.mxu1 }
 0x12b   :  { %v151_v18 = vadd.f32 %v150_v15, %v108_v14 }
 0x12d   :  { %v167_v19 = vrot.slane %v151_v18, 1  ;;  %v182_v20 = vrot.slane %v151_v18, 2  ;;  %v195_v28 = vpack.c.bf16 %v151_v18, %v151_v18 }
 0x12f   :  { %v168_v22 = vsel %vm159_vm2, %v165_v16, %v167_v19  ;;  %v183_v24 = vsel %vm174_vm3, %v180_v17, %v182_v20  ;;  %v196_v29 = vpack.c.bf16 %v167_v19, %v167_v19  ;;  %v197_v30 = vpack.c.bf16 %v182_v20, %v182_v20  ;;  %v481_v6 = vpop.permute.xlu0 %480  ;;  %v486_v19 = vpop.permute.xlu1 %485 }
 0x130   :  { %v193_v25 = vpack.c.bf16 %v168_v22, %v166_v21  ;;  %v194_v26 = vpack.c.bf16 %v183_v24, %v181_v23 }
 0x132   :  { %v152_v27 = vpop.f32.mrf.mxu1  ;;  %430 = vmatmul.bf16.gmra.mxu3 %v193_v25  ;;  %453 = vmatmul.bf16.gmra.mxu0 %v194_v26 }
 0x137   :  { %412 = vmatmul.bf16.gmra.mxu2 %v195_v28  ;;  %v491_v40 = vpop.permute.xlu1 %490 }
 0x142   :  { %435 = vmatmul.bf16.gmra.mxu3 %v196_v29  ;;  %458 = vmatmul.bf16.gmra.mxu0 %v197_v30 }
 0x19a   :  { %v403_v49 = vpop.f32.mrf.mxu2 }
 0x19b   :  { %v404_v57 = vadd.f32 %v1412_v53, %v403_v49 }
 0x19f   :  { %v449_v52 = vpop.f32.mrf.mxu0 }
 0x1a2   :  { %v405_v56 = vpop.f32.mrf.mxu2 }
 0x1a3   :  { %v406_v0 = vadd.f32 %v1412_v53, %v405_v56  ;;  %v496_v56 = vpop.permute.xlu2 %495 }
 0x1a5   :  { %v426_v58 = vpop.f32.mrf.mxu3 }
 0x1a6   :  { %v427_v59 = vadd.f32 %v426_v58, %v404_v57 }
 0x1a7   :  { %v451_v60 = vpop.f32.mrf.mxu0 }
 0x1a8   :  { %v450_v62 = vadd.f32 %v449_v52, %v427_v59 }
 0x1aa   :  { %v408_v63 = vpop.f32.mrf.mxu2  ;;  %v463_v2 = vmax.f32 %v450_v62, 0.0 }
 0x1ab   :  { %v409_v10 = vadd.f32 %v1412_v53, %v408_v63 }
 0x1ac   :  { %v498_v7 = vmul.f32 %v476_v61, %v463_v2 }
 0x1ad   :  { %v428_v1 = vpop.f32.mrf.mxu3 }
 0x1ae   :  { %v429_v3 = vadd.f32 %v428_v1, %v406_v0  ;;  %v509_v13 = vrot.slane %v498_v7, 7 }
 0x1af   :  { %v454_v4 = vpop.f32.mrf.mxu0 }
 0x1b0   :  { %v452_v5 = vadd.f32 %v451_v60, %v429_v3  ;;  %v523_v26 = vsel %vm508_vm4, 0.0, %v509_v13 }
 0x1b1   :  { %v528_v34 = vrot.slane %v523_v26, 1  ;;  %v542_v35 = vrot.slane %v523_v26, 2 }
 0x1b2   :  { %v410_v8 = vpop.f32.mrf.mxu2  ;;  %v464_v9 = vmax.f32 %v452_v5, 0.0 }
 0x1b3   :  { %v411_v23 = vadd.f32 %v1412_v53, %v410_v8 }
 0x1b4   :  { %v499_v11 = vmul.f32 %v481_v6, %v464_v9 }
 0x1b5   :  { %v431_v12 = vpop.f32.mrf.mxu3 }
 0x1b6   :  { %v510_v14 = vrot.slane %v499_v11, 7  ;;  %v432_v15 = vadd.f32 %v431_v12, %v409_v10 }
 0x1b7   :  { %v456_v16 = vpop.f32.mrf.mxu0 }
 0x1b8   :  { %v511_v17 = vsel %vm508_vm4, %v509_v13, %v510_v14  ;;  %v455_v18 = vadd.f32 %v454_v4, %v432_v15 }
 0x1b9   :  { %v1084_v20 = vpack.c.bf16 %v511_v17, %v509_v13  ;;  %v529_v29 = vrot.slane %v511_v17, 1  ;;  %v543_v30 = vrot.slane %v511_v17, 2 }
 0x1ba   :  { %v465_v21 = vmax.f32 %v455_v18, 0.0  ;;  %v413_v22 = vpop.f32.mrf.mxu2 }
 0x1bb   :  { %1085 = vmatmul.msk.bf16.vlgmr.msrb.gmra.mxu1 %vm1083_vm7, %v1084_v20  ;;  %v530_v41 = vsel %vm159_vm2, %v528_v34, %v529_v29  ;;  %v544_v43 = vsel %vm174_vm3, %v542_v35, %v543_v30  ;;  %v414_v45 = vadd.f32 %v1412_v53, %v413_v22 }
 0x1bc   :  { %v500_v24 = vmul.f32 %v486_v19, %v465_v21 }
 0x1bd   :  { %v433_v25 = vpop.f32.mrf.mxu3 }
 0x1be   :  { %v512_v27 = vrot.slane %v500_v24, 7  ;;  %v434_v28 = vadd.f32 %v433_v25, %v411_v23 }
 0x1bf   :  { %v459_v31 = vpop.f32.mrf.mxu0 }
 0x1c0   :  { %v513_v32 = vsel %vm508_vm4, %v510_v14, %v512_v27  ;;  %v457_v33 = vadd.f32 %v456_v16, %v434_v28  ;;  %v1165_v14 = vld [vmem:[%s1463_s8] ss:$0 sm:$0xff] }
 0x1c1   :  { %v531_v36 = vrot.slane %v513_v32, 1  ;;  %v545_v37 = vrot.slane %v513_v32, 2 }
 0x1c2   :  { %v466_v38 = vmax.f32 %v457_v33, 0.0  ;;  %v415_v39 = vpop.f32.mrf.mxu2 }
 0x1c3   :  { %v532_v42 = vsel %vm159_vm2, %v529_v29, %v531_v36  ;;  %v546_v44 = vsel %vm174_vm3, %v543_v30, %v545_v37 }
 0x1c4   :  { %v501_v46 = vmul.f32 %v491_v40, %v466_v38  ;;  %v557_v47 = vpack.c.bf16 %v532_v42, %v530_v41  ;;  %v558_v48 = vpack.c.bf16 %v546_v44, %v544_v43 }
 0x1c5   :  { %v436_v49 = vpop.f32.mrf.mxu3 }
 0x1c6   :  { %v514_v50 = vrot.slane %v501_v46, 7  ;;  %v437_v51 = vadd.f32 %v436_v49, %v414_v45  ;;  %792 = vmatmul.bf16.vlgmr.msrb.gmra.mxu2 %v557_v47  ;;  %815 = vmatmul.bf16.vlgmr.msrb.gmra.mxu3 %v558_v48 }
 0x1c7   :  { %v461_v52 = vpop.f32.mrf.mxu0 }
 0x1c8   :  { %v460_v54 = vadd.f32 %v459_v31, %v437_v51  ;;  %v515_v55 = vsel %vm508_vm4, %v512_v27, %v514_v50 }
 0x1c9   :  { %v559_v57 = vpack.c.bf16 %v515_v55, %v513_v32  ;;  %v533_v62 = vrot.slane %v515_v55, 1  ;;  %v547_v63 = vrot.slane %v515_v55, 2 }
 0x1ca   :  { %v467_v58 = vmax.f32 %v460_v54, 0.0 }
 0x1cb   :  { %774 = vmatmul.bf16.gmra.mxu1 %v559_v57  ;;  %v534_v3 = vsel %vm159_vm2, %v531_v36, %v533_v62  ;;  %v548_v5 = vsel %vm174_vm3, %v545_v37, %v547_v63 }
 0x1cc   :  { %v502_v59 = vmul.f32 %v496_v56, %v467_v58 }
 0x1cd   :  { %v438_v60 = vpop.f32.mrf.mxu3 }
 0x1ce   :  { %v516_v53 = vrot.slane %v502_v59, 7 }
 0x1d0   :  { %v517_v61 = vsel %vm508_vm4, %v514_v50, %v516_v53 }
 0x1d1   :  { %v525_v0 = vsel %vm524_vm8, %v517_v61, 0.0  ;;  %v1087_v9 = vpack.c.bf16 %v517_v61, %v517_v61 }
 0x1d2   :  { %v535_v1 = vrot.slane %v525_v0, 1  ;;  %v549_v2 = vrot.slane %v525_v0, 2 }
 0x1d4   :  { %v536_v4 = vsel %vm159_vm2, %v533_v62, %v535_v1  ;;  %v550_v6 = vsel %vm174_vm3, %v547_v63, %v549_v2  ;;  %v563_v10 = vpack.c.bf16 %v535_v1, %v535_v1  ;;  %v564_v11 = vpack.c.bf16 %v549_v2, %v549_v2 }
 0x1d5   :  { %v560_v7 = vpack.c.bf16 %v536_v4, %v534_v3  ;;  %v561_v8 = vpack.c.bf16 %v550_v6, %v548_v5 }
 0x1d7   :  { %797 = vmatmul.bf16.gmra.mxu2 %v560_v7  ;;  %820 = vmatmul.bf16.gmra.mxu3 %v561_v8 }
 0x1db   :  { %1088 = vmatmul.msk.bf16.gmra.mxu1 %vm1086_vm9, %v1087_v9 }
 0x1e7   :  { %802 = vmatmul.bf16.gmra.mxu2 %v563_v10  ;;  %825 = vmatmul.bf16.gmra.mxu3 %v564_v11 }
 0x238   :  { %v770_v12 = vpop.f32.mrf.mxu1 }
 0x239   :  { %v771_v18 = vadd.f32 %v1165_v14, %v770_v12 }
 0x240   :  { %v772_v13 = vpop.f32.mrf.mxu1 }
 0x241   :  { %v773_v20 = vadd.f32 %v1165_v14, %v772_v13 }
 0x248   :  { %v775_v15 = vpop.f32.mrf.mxu1 }
 0x249   :  { %v793_v16 = vpop.f32.mrf.mxu2  ;;  %v816_v17 = vpop.f32.mrf.mxu3  ;;  %v776_v31 = vadd.f32 %v1165_v14, %v775_v15 }
 0x24a   :  { %v794_v19 = vadd.f32 %v793_v16, %v771_v18 }
 0x24c   :  { %v817_v24 = vadd.f32 %v816_v17, %v794_v19 }
 0x24e   :  { %v830_v27 = vmax.f32 %v817_v24, 0.0 }
 0x250   :  { %v777_v21 = vpop.f32.mrf.mxu1 }
 0x251   :  { %v795_v22 = vpop.f32.mrf.mxu2  ;;  %v818_v23 = vpop.f32.mrf.mxu3  ;;  %v778_v37 = vadd.f32 %v1165_v14, %v777_v21 }
 0x252   :  { %v796_v25 = vadd.f32 %v795_v22, %v773_v20 }
 0x254   :  { %v819_v26 = vadd.f32 %v818_v23, %v796_v25 }
 0x256   :  { %v831_v28 = vmax.f32 %v819_v26, 0.0 }
 0x258   :  { %v1156_v29 = vpack.c.bf16 %v831_v28, %v830_v27  ;;  %v780_v30 = vpop.f32.mrf.mxu1 }
 0x259   :  { %v781_v45 = vadd.f32 %v1165_v14, %v780_v30 }
 0x25a   :  { %1157 = vst [vmem:[%s1464_s9] sm:$0xff] %v1156_v29   ;;  %v798_v32 = vpop.f32.mrf.mxu2  ;;  %v821_v33 = vpop.f32.mrf.mxu3 }
 0x25b   :  { %v799_v34 = vadd.f32 %v798_v32, %v776_v31 }
 0x25d   :  { %v822_v35 = vadd.f32 %v821_v33, %v799_v34 }
 0x25f   :  { %v832_v40 = vmax.f32 %v822_v35, 0.0 }
 0x260   :  { %v782_v36 = vpop.f32.mrf.mxu1 }
 0x261   :  { %v839_v43 = vpack.c.bf16 %v832_v40, %v832_v40 }
 0x262   :  { %v800_v38 = vpop.f32.mrf.mxu2  ;;  %v823_v39 = vpop.f32.mrf.mxu3 }
 0x263   :  { %v801_v41 = vadd.f32 %v800_v38, %v778_v37  ;;  %v1089_v49 = vrot.slane %v839_v43, 9 }
 0x265   :  { %v824_v42 = vadd.f32 %v823_v39, %v801_v41 }
 0x267   :  { %v833_v44 = vmax.f32 %v824_v42, 0.0 }
 0x269   :  { %v840_v46 = vpack.c.bf16 %v833_v44, %v833_v44 }
 0x26a   :  { %v803_v47 = vpop.f32.mrf.mxu2  ;;  %v826_v48 = vpop.f32.mrf.mxu3 }
 0x26b   :  { %v850_v50 = vrot.slane %v840_v46, 5  ;;  %v804_v51 = vadd.f32 %v803_v47, %v781_v45 }
 0x26d   :  { %v851_v52 = vsel %vm847_vm11, %v1089_v49, %v850_v50  ;;  %v827_v54 = vadd.f32 %v826_v48, %v804_v51  ;;  %v852_v59 = vrot.slane %v850_v50, 4 }
 0x26e   :  { %1090 = vst [vmem:[%s1464_s9 + $0x8] sm:$0xf] %v851_v52 }
 0x26f   :  { %v834_v55 = vmax.f32 %v827_v54, 0.0 }
 0x271   :  { %v841_v56 = vpack.c.bf16 %v834_v55, %v834_v55 }
 0x272   :  { %v805_v57 = vpop.f32.mrf.mxu2  ;;  %v828_v58 = vpop.f32.mrf.mxu3 }
 0x273   :  { %v853_v60 = vrot.slane %v841_v56, 5 }
 0x275   :  { %v854_v53 = vsel %vm847_vm11, %v852_v59, %v853_v60 }
 0x276   :  { %1091 = vst [vmem:[%s1464_s9 + $0xc] sm:$0xf] %v854_v53 }

</bundles_post_ra>
